<compile_context>
chip_gen: v7x
topology: tpu7x:2x2x1
jax: 0.10.0
libtpu: 0.0.40
codegen_flags: <defaults>
</compile_context>

<pallas_src>
import functools
import math

import jax
import jax.numpy as jnp
from jax.experimental import pallas as pl
from jax.experimental.pallas import tpu as pltpu

LN_EPS = 1e-5


def _block_kernel(
    x_ref,        # (1, T, D)    f32
    ln1g_ref,     # (1, D)       f32
    ln1b_ref,     # (1, D)       f32
    w_qkv_ref,    # (H, D, 3*Hd) bf16   per-head columns: [Q_h | K_h | V_h]
    w_out_ref,    # (H, Hd, D)   bf16
    b_out_ref,    # (1, D)       f32
    ln2g_ref,     # (1, D)       f32
    ln2b_ref,     # (1, D)       f32
    w1_ref,       # (D, 4D)      bf16
    b1_ref,       # (1, 4D)      f32
    w2_ref,       # (4D, D)      bf16
    b2_ref,       # (1, D)       f32
    o_ref,        # (1, T, D)    f32
    *,
    n_heads,
    head_size,
):
    x = x_ref[0]                      # (T, D) f32
    T, D = x.shape

    def layer_norm(v, g, b):
        mu = jnp.mean(v, axis=-1, keepdims=True)
        var = jnp.mean((v - mu) ** 2, axis=-1, keepdims=True)
        return (v - mu) * jax.lax.rsqrt(var + LN_EPS) * g + b

    # ---------------- LayerNorm 1 + causal multi-head attention --------------
    xn1 = layer_norm(x, ln1g_ref[...], ln1b_ref[...])
    xn1_bf = xn1.astype(jnp.bfloat16)

    row = jax.lax.broadcasted_iota(jnp.int32, (T, T), 0)
    col = jax.lax.broadcasted_iota(jnp.int32, (T, T), 1)
    causal = row >= col
    neg_big = jnp.float32(-1e30)                    # finite: no NaN risk
    scale = jnp.float32(1.0 / math.sqrt(head_size))

    def head_body(h, acc):
        # per-head fused QKV projection: one (T,D)x(D,3*Hd) bf16 MXU matmul
        qkv_h = jnp.dot(xn1_bf, w_qkv_ref[h], preferred_element_type=jnp.float32)
        qh = qkv_h[:, :head_size] * scale           # scale folded into q
        kh = qkv_h[:, head_size:2 * head_size]
        vh = qkv_h[:, 2 * head_size:]

        # (T,Hd)x(T,Hd) contracting the head dim -> (T,T); no explicit k.T
        s = jax.lax.dot_general(
            qh.astype(jnp.bfloat16), kh.astype(jnp.bfloat16),
            (((1,), (1,)), ((), ())), preferred_element_type=jnp.float32)
        s = jnp.where(causal, s, neg_big)

        # numerically stable softmax (f32); normalization deferred to (T,Hd)
        m = jnp.max(s, axis=-1, keepdims=True)
        p = jnp.exp(s - m)
        l = jnp.sum(p, axis=-1, keepdims=True)
        oh = jnp.dot(p.astype(jnp.bfloat16), vh.astype(jnp.bfloat16),
                     preferred_element_type=jnp.float32)        # (T, Hd)
        oh = oh * pl.reciprocal(l, approx=True)                 # EUP slot

        # fused per-head output projection -> accumulate (no head concat)
        return acc + jnp.dot(oh.astype(jnp.bfloat16), w_out_ref[h],
                             preferred_element_type=jnp.float32)  # (T, D)

    attn = jax.lax.fori_loop(0, n_heads, head_body,
                             jnp.zeros((T, D), jnp.float32),
                             unroll=(n_heads <= 8))

    x1 = x + attn + b_out_ref[...]                  # residual (dropout = identity)

    # ---------------- LayerNorm 2 + FeedForward ------------------------------
    xn2 = layer_norm(x1, ln2g_ref[...], ln2b_ref[...])
    h1 = jnp.maximum(
        jnp.dot(xn2.astype(jnp.bfloat16), w1_ref[...],
                preferred_element_type=jnp.float32) + b1_ref[...], 0.0)
    h2 = jnp.dot(h1.astype(jnp.bfloat16), w2_ref[...],
                 preferred_element_type=jnp.float32) + b2_ref[...]

    o_ref[0] = x1 + h2                              # residual (dropout = identity)


def block_forward(x, ln1_g, ln1_b, w_q, w_k, w_v, w_out, b_out,
                  ln2_g, ln2_b, w_ff1, b_ff1, w_ff2, b_ff2, *, n_heads):
    """Block forward.  x: (B,T,D) f32; w_q/w_k/w_v: (H,D,Hd); returns (B,T,D) f32."""
    B, T, D = x.shape
    head_size = D // n_heads
    Dff = w_ff1.shape[1]

    # ---- call-boundary layout prep + bf16 weight cast (halves weight VMEM) --
    w_qkv = jnp.concatenate([w_q, w_k, w_v], axis=-1).astype(jnp.bfloat16)  # (H,D,3*Hd)
    w_out_h = w_out.reshape(n_heads, head_size, D).astype(jnp.bfloat16)     # (H,Hd,D)
    w1 = w_ff1.astype(jnp.bfloat16)
    w2 = w_ff2.astype(jnp.bfloat16)
    ln1_g = jnp.asarray(ln1_g, jnp.float32).reshape(1, D)
    ln1_b = jnp.asarray(ln1_b, jnp.float32).reshape(1, D)
    ln2_g = jnp.asarray(ln2_g, jnp.float32).reshape(1, D)
    ln2_b = jnp.asarray(ln2_b, jnp.float32).reshape(1, D)
    b_out = jnp.asarray(b_out, jnp.float32).reshape(1, D)
    b1 = jnp.asarray(b_ff1, jnp.float32).reshape(1, Dff)
    b2 = jnp.asarray(b_ff2, jnp.float32).reshape(1, D)

    # ---- explicit VMEM budget: double-buffered blocks + in-kernel intermediates
    params = (ln1_g, ln1_b, w_qkv, w_out_h, b_out, ln2_g, ln2_b, w1, b1, w2, b2)
    param_bytes = sum(int(a.size) * a.dtype.itemsize for a in params)
    io_bytes = 2 * T * D * 4                              # one x block + one out block
    act_bytes = 4 * (T * T + 4 * T * head_size + T * Dff + 8 * T * D)
    vmem_limit = int(min(64 * 1024 * 1024,
                         max(2 * (2 * (param_bytes + io_bytes) + act_bytes),
                             8 * 1024 * 1024)))

    kernel = functools.partial(_block_kernel, n_heads=n_heads, head_size=head_size)
    rep2 = lambda b: (0, 0)            # weights/biases: same block every grid step
    rep3 = lambda b: (0, 0, 0)         # (single-buffering them via pl.Buffered(1)
                                       #  would further halve weight VMEM)

    return pl.pallas_call(
        kernel,
        out_shape=jax.ShapeDtypeStruct((B, T, D), jnp.float32),
        grid_spec=pltpu.PrefetchScalarGridSpec(
            num_scalar_prefetch=0,
            grid=(B,),
            in_specs=[
                pl.BlockSpec((1, T, D), lambda b: (b, 0, 0)),        # x
                pl.BlockSpec((1, D), rep2),                          # ln1 gamma
                pl.BlockSpec((1, D), rep2),                          # ln1 beta
                pl.BlockSpec((n_heads, D, 3 * head_size), rep3),     # W_qkv (bf16)
                pl.BlockSpec((n_heads, head_size, D), rep3),         # W_out (bf16)
                pl.BlockSpec((1, D), rep2),                          # b_out
                pl.BlockSpec((1, D), rep2),                          # ln2 gamma
                pl.BlockSpec((1, D), rep2),                          # ln2 beta
                pl.BlockSpec((D, Dff), rep2),                        # W_ff1 (bf16)
                pl.BlockSpec((1, Dff), rep2),                        # b_ff1
                pl.BlockSpec((Dff, D), rep2),                        # W_ff2 (bf16)
                pl.BlockSpec((1, D), rep2),                          # b_ff2
            ],
            out_specs=pl.BlockSpec((1, T, D), lambda b: (b, 0, 0)),
        ),
        compiler_params=pltpu.CompilerParams(
            dimension_semantics=("parallel",),     # batch shards across TCs (v7x)
            vmem_limit_bytes=vmem_limit,
        ),
    )(x, ln1_g, ln1_b, w_qkv, w_out_h, b_out, ln2_g, ln2_b, w1, b1, w2, b2)


if __name__ == "__main__":
    # small shapes consistent with the module
    B, T, D = 2, 8, 32
    n_heads = 4
    head_size = D // n_heads
    hhd = n_heads * head_size

    key = jax.random.PRNGKey(0)
    keys = jax.random.split(key, 14)

    x = jax.random.normal(keys[0], (B, T, D), jnp.float32)

    ln1_g = 1.0 + 0.1 * jax.random.normal(keys[1], (D,), jnp.float32)
    ln1_b = 0.1 * jax.random.normal(keys[2], (D,), jnp.float32)
    ln2_g = 1.0 + 0.1 * jax.random.normal(keys[3], (D,), jnp.float32)
    ln2_b = 0.1 * jax.random.normal(keys[4], (D,), jnp.float32)

    # per-head Q/K/V weights (bias=False), pre-transposed for x @ W: (H, D, Hd)
    w_q = 0.05 * jax.random.normal(keys[5], (n_heads, D, head_size), jnp.float32)
    w_k = 0.05 * jax.random.normal(keys[6], (n_heads, D, head_size), jnp.float32)
    w_v = 0.05 * jax.random.normal(keys[7], (n_heads, D, head_size), jnp.float32)

    # MultiHead out-projection Linear(hhd, D), pre-transposed: (hhd, D)
    w_out = 0.05 * jax.random.normal(keys[8], (hhd, D), jnp.float32)
    b_out = 0.05 * jax.random.normal(keys[9], (D,), jnp.float32)

    # FeedForward: Linear(D, 4D) -> relu -> Linear(4D, D)
    w_ff1 = 0.05 * jax.random.normal(keys[10], (D, 4 * D), jnp.float32)
    b_ff1 = 0.05 * jax.random.normal(keys[11], (4 * D,), jnp.float32)
    w_ff2 = 0.05 * jax.random.normal(keys[12], (4 * D, D), jnp.float32)
    b_ff2 = 0.05 * jax.random.normal(keys[13], (D,), jnp.float32)

    out = block_forward(x, ln1_g, ln1_b, w_q, w_k, w_v, w_out, b_out,
                        ln2_g, ln2_b, w_ff1, b_ff1, w_ff2, b_ff2, n_heads=n_heads)
    out = jax.block_until_ready(out)

    # ---------------- pure-JAX f32 reference (eval-mode Block) ---------------
    def layer_norm_ref(v, g, b):
        mu = v.mean(-1, keepdims=True)
        var = ((v - mu) ** 2).mean(-1, keepdims=True)
        return (v - mu) / jnp.sqrt(var + LN_EPS) * g + b

    def ref(xin):
        xn1 = layer_norm_ref(xin, ln1_g, ln1_b)
        causal = jnp.tril(jnp.ones((T, T), bool))
        heads = []
        for h in range(n_heads):
            q = xn1 @ w_q[h]
            k_ = xn1 @ w_k[h]
            v = xn1 @ w_v[h]
            att = (q @ jnp.swapaxes(k_, -1, -2)) / jnp.sqrt(jnp.float32(head_size))
            att = jnp.where(causal[None], att, -jnp.inf)
            att = jax.nn.softmax(att, axis=-1)
            heads.append(att @ v)
        x1 = xin + jnp.concatenate(heads, axis=-1) @ w_out + b_out
        xn2 = layer_norm_ref(x1, ln2_g, ln2_b)
        ff = jnp.maximum(xn2 @ w_ff1 + b_ff1, 0.0) @ w_ff2 + b_ff2
        return x1 + ff

    ref_out = ref(x)
    assert out.shape == (B, T, D)
    # tolerance covers bf16 MXU operands + approx softmax reciprocal
    max_err = jnp.max(jnp.abs(out - ref_out))
    assert jnp.allclose(out, ref_out, atol=3e-2, rtol=3e-2), (
        f"mismatch vs reference (max abs err {max_err})")

    print("KERNEL_OK")
</pallas_src>

<mosaic_0001>
module attributes {stable_mosaic.version = 11 : i64} {
  func.func @_block_kernel(%arg0: i32, %arg1: memref<1x8x32xf32, #tpu.memory_space<vmem>>, %arg2: memref<1x32xf32, #tpu.memory_space<vmem>>, %arg3: memref<1x32xf32, #tpu.memory_space<vmem>>, %arg4: memref<4x32x24xbf16, #tpu.memory_space<vmem>>, %arg5: memref<4x8x32xbf16, #tpu.memory_space<vmem>>, %arg6: memref<1x32xf32, #tpu.memory_space<vmem>>, %arg7: memref<1x32xf32, #tpu.memory_space<vmem>>, %arg8: memref<1x32xf32, #tpu.memory_space<vmem>>, %arg9: memref<32x128xbf16, #tpu.memory_space<vmem>>, %arg10: memref<1x128xf32, #tpu.memory_space<vmem>>, %arg11: memref<128x32xbf16, #tpu.memory_space<vmem>>, %arg12: memref<1x32xf32, #tpu.memory_space<vmem>>, %arg13: memref<1x8x32xf32, #tpu.memory_space<vmem>>) attributes {dimension_semantics = [#tpu.dimension_semantics<parallel>], iteration_bounds = array<i64: 2>, scalar_prefetch = 0 : i64, scratch_operands = 0 : i64, tpu.core_type = #tpu.core_type<tc>, window_params = [{transform_indices = @transform_0, window_bounds = array<i64: 1, 8, 32>}, {pipeline_mode = #tpu.pipeline_mode<synchronous>, transform_indices = @transform_1, window_bounds = array<i64: 1, 32>}, {pipeline_mode = #tpu.pipeline_mode<synchronous>, transform_indices = @transform_2, window_bounds = array<i64: 1, 32>}, {pipeline_mode = #tpu.pipeline_mode<synchronous>, transform_indices = @transform_3, window_bounds = array<i64: 4, 32, 24>}, {pipeline_mode = #tpu.pipeline_mode<synchronous>, transform_indices = @transform_4, window_bounds = array<i64: 4, 8, 32>}, {pipeline_mode = #tpu.pipeline_mode<synchronous>, transform_indices = @transform_5, window_bounds = array<i64: 1, 32>}, {pipeline_mode = #tpu.pipeline_mode<synchronous>, transform_indices = @transform_6, window_bounds = array<i64: 1, 32>}, {pipeline_mode = #tpu.pipeline_mode<synchronous>, transform_indices = @transform_7, window_bounds = array<i64: 1, 32>}, {pipeline_mode = #tpu.pipeline_mode<synchronous>, transform_indices = @transform_8, window_bounds = array<i64: 32, 128>}, {pipeline_mode = #tpu.pipeline_mode<synchronous>, transform_indices = @transform_9, window_bounds = array<i64: 1, 128>}, {pipeline_mode = #tpu.pipeline_mode<synchronous>, transform_indices = @transform_10, window_bounds = array<i64: 128, 32>}, {pipeline_mode = #tpu.pipeline_mode<synchronous>, transform_indices = @transform_11, window_bounds = array<i64: 1, 32>}, {transform_indices = @transform_12, window_bounds = array<i64: 1, 8, 32>}]} {
    %c0 = arith.constant 0 : index
    %c0_0 = arith.constant 0 : index
    %c0_1 = arith.constant 0 : index
    %0 = vector.load %arg1[%c0, %c0_0, %c0_1] : memref<1x8x32xf32, #tpu.memory_space<vmem>>, vector<1x8x32xf32>
    %1 = vector.shape_cast %0 : vector<1x8x32xf32> to vector<8x32xf32>
    %c0_2 = arith.constant 0 : index
    %c0_3 = arith.constant 0 : index
    %2 = vector.load %arg2[%c0_2, %c0_3] : memref<1x32xf32, #tpu.memory_space<vmem>>, vector<1x32xf32>
    %c0_4 = arith.constant 0 : index
    %c0_5 = arith.constant 0 : index
    %3 = vector.load %arg3[%c0_4, %c0_5] : memref<1x32xf32, #tpu.memory_space<vmem>>, vector<1x32xf32>
    %cst = arith.constant dense<0.000000e+00> : vector<8xf32>
    %4 = vector.multi_reduction <add>, %1, %cst [1] : vector<8x32xf32> to vector<8xf32>
    %5 = vector.shape_cast %4 : vector<8xf32> to vector<8x1xf32>
    %cst_6 = arith.constant 3.200000e+01 : f32
    %6 = vector.broadcast %cst_6 : f32 to vector<8x1xf32>
    %7 = arith.divf %5, %6 : vector<8x1xf32>
    %8 = vector.broadcast %7 : vector<8x1xf32> to vector<8x32xf32>
    %9 = arith.subf %1, %8 : vector<8x32xf32>
    %10 = arith.mulf %9, %9 : vector<8x32xf32>
    %cst_7 = arith.constant dense<0.000000e+00> : vector<8xf32>
    %11 = vector.multi_reduction <add>, %10, %cst_7 [1] : vector<8x32xf32> to vector<8xf32>
    %12 = vector.shape_cast %11 : vector<8xf32> to vector<8x1xf32>
    %cst_8 = arith.constant 3.200000e+01 : f32
    %13 = vector.broadcast %cst_8 : f32 to vector<8x1xf32>
    %14 = arith.divf %12, %13 : vector<8x1xf32>
    %15 = vector.broadcast %7 : vector<8x1xf32> to vector<8x32xf32>
    %16 = arith.subf %1, %15 : vector<8x32xf32>
    %cst_9 = arith.constant 9.99999974E-6 : f32
    %17 = vector.broadcast %cst_9 : f32 to vector<8x1xf32>
    %18 = arith.addf %14, %17 : vector<8x1xf32>
    %19 = math.rsqrt %18 : vector<8x1xf32>
    %20 = vector.broadcast %19 : vector<8x1xf32> to vector<8x32xf32>
    %21 = arith.mulf %16, %20 : vector<8x32xf32>
    %22 = vector.broadcast %2 : vector<1x32xf32> to vector<8x32xf32>
    %23 = arith.mulf %21, %22 : vector<8x32xf32>
    %24 = vector.broadcast %3 : vector<1x32xf32> to vector<8x32xf32>
    %25 = arith.addf %23, %24 : vector<8x32xf32>
    %26 = arith.truncf %25 : vector<8x32xf32> to vector<8x32xbf16>
    %27 = tpu.iota {dimensions = array<i32: 0>} : vector<8x8xi32>
    %28 = tpu.iota {dimensions = array<i32: 1>} : vector<8x8xi32>
    %29 = arith.cmpi sge, %27, %28 : vector<8x8xi32>
    %cst_10 = arith.constant 0.000000e+00 : f32
    %30 = vector.broadcast %cst_10 : f32 to vector<8x32xf32>
    %cst_11 = arith.constant 0.353553385 : f32
    %cst_12 = arith.constant -1.000000e+30 : f32
    %c0_i32 = arith.constant 0 : i32
    %31 = arith.index_cast %c0_i32 : i32 to index
    %c0_13 = arith.constant 0 : index
    %c0_14 = arith.constant 0 : index
    %32 = vector.load %arg4[%31, %c0_13, %c0_14] : memref<4x32x24xbf16, #tpu.memory_space<vmem>>, vector<1x32x24xbf16>
    %33 = vector.shape_cast %32 : vector<1x32x24xbf16> to vector<32x24xbf16>
    %cst_15 = arith.constant dense<0.000000e+00> : vector<8x24xf32>
    %34 = tpu.matmul %26, %33, %cst_15 {dimension_numbers = #tpu.dot_dimension_numbers<[1], [0], [0], [1], [0, 0, 1, 1], [], []>} : vector<8x32xbf16>, vector<32x24xbf16>, vector<8x24xf32> -> vector<8x24xf32>
    %35 = vector.extract_strided_slice %34 {offsets = [0, 0], sizes = [8, 8], strides = [1, 1]} : vector<8x24xf32> to vector<8x8xf32>
    %36 = vector.broadcast %cst_11 : f32 to vector<8x8xf32>
    %37 = arith.mulf %35, %36 : vector<8x8xf32>
    %38 = vector.extract_strided_slice %34 {offsets = [0, 8], sizes = [8, 8], strides = [1, 1]} : vector<8x24xf32> to vector<8x8xf32>
    %39 = vector.extract_strided_slice %34 {offsets = [0, 16], sizes = [8, 8], strides = [1, 1]} : vector<8x24xf32> to vector<8x8xf32>
    %40 = arith.truncf %37 : vector<8x8xf32> to vector<8x8xbf16>
    %41 = arith.truncf %38 : vector<8x8xf32> to vector<8x8xbf16>
    %cst_16 = arith.constant dense<0.000000e+00> : vector<8x8xf32>
    %42 = tpu.matmul %40, %41, %cst_16 {dimension_numbers = #tpu.dot_dimension_numbers<[1], [1], [0], [0], [0, 0, 1, 0], [], []>} : vector<8x8xbf16>, vector<8x8xbf16>, vector<8x8xf32> -> vector<8x8xf32>
    %43 = vector.broadcast %cst_12 : f32 to vector<8x8xf32>
    %44 = arith.select %29, %42, %43 : vector<8x8xi1>, vector<8x8xf32>
    %cst_17 = arith.constant dense<0xFF800000> : vector<8xf32>
    %45 = vector.multi_reduction <maximumf>, %44, %cst_17 [1] : vector<8x8xf32> to vector<8xf32>
    %46 = vector.shape_cast %45 : vector<8xf32> to vector<8x1xf32>
    %47 = vector.broadcast %46 : vector<8x1xf32> to vector<8x8xf32>
    %48 = arith.subf %44, %47 : vector<8x8xf32>
    %49 = math.exp %48 : vector<8x8xf32>
    %cst_18 = arith.constant dense<0.000000e+00> : vector<8xf32>
    %50 = vector.multi_reduction <add>, %49, %cst_18 [1] : vector<8x8xf32> to vector<8xf32>
    %51 = vector.shape_cast %50 : vector<8xf32> to vector<8x1xf32>
    %52 = arith.truncf %49 : vector<8x8xf32> to vector<8x8xbf16>
    %53 = arith.truncf %39 : vector<8x8xf32> to vector<8x8xbf16>
    %cst_19 = arith.constant dense<0.000000e+00> : vector<8x8xf32>
    %54 = tpu.matmul %52, %53, %cst_19 {dimension_numbers = #tpu.dot_dimension_numbers<[1], [0], [0], [1], [0, 0, 1, 1], [], []>} : vector<8x8xbf16>, vector<8x8xbf16>, vector<8x8xf32> -> vector<8x8xf32>
    %55 = tpu.reciprocal %51 {approx = true} : vector<8x1xf32> -> vector<8x1xf32>
    %56 = vector.broadcast %55 : vector<8x1xf32> to vector<8x8xf32>
    %57 = arith.mulf %54, %56 : vector<8x8xf32>
    %58 = arith.truncf %57 : vector<8x8xf32> to vector<8x8xbf16>
    %59 = arith.index_cast %c0_i32 : i32 to index
    %c0_20 = arith.constant 0 : index
    %c0_21 = arith.constant 0 : index
    %60 = vector.load %arg5[%59, %c0_20, %c0_21] : memref<4x8x32xbf16, #tpu.memory_space<vmem>>, vector<1x8x32xbf16>
    %61 = vector.shape_cast %60 : vector<1x8x32xbf16> to vector<8x32xbf16>
    %cst_22 = arith.constant dense<0.000000e+00> : vector<8x32xf32>
    %62 = tpu.matmul %58, %61, %cst_22 {dimension_numbers = #tpu.dot_dimension_numbers<[1], [0], [0], [1], [0, 0, 1, 1], [], []>} : vector<8x8xbf16>, vector<8x32xbf16>, vector<8x32xf32> -> vector<8x32xf32>
    %63 = arith.addf %30, %62 : vector<8x32xf32>
    %c1_i32 = arith.constant 1 : i32
    %64 = arith.index_cast %c1_i32 : i32 to index
    %c0_23 = arith.constant 0 : index
    %c0_24 = arith.constant 0 : index
    %65 = vector.load %arg4[%64, %c0_23, %c0_24] : memref<4x32x24xbf16, #tpu.memory_space<vmem>>, vector<1x32x24xbf16>
    %66 = vector.shape_cast %65 : vector<1x32x24xbf16> to vector<32x24xbf16>
    %cst_25 = arith.constant dense<0.000000e+00> : vector<8x24xf32>
    %67 = tpu.matmul %26, %66, %cst_25 {dimension_numbers = #tpu.dot_dimension_numbers<[1], [0], [0], [1], [0, 0, 1, 1], [], []>} : vector<8x32xbf16>, vector<32x24xbf16>, vector<8x24xf32> -> vector<8x24xf32>
    %68 = vector.extract_strided_slice %67 {offsets = [0, 0], sizes = [8, 8], strides = [1, 1]} : vector<8x24xf32> to vector<8x8xf32>
    %69 = vector.broadcast %cst_11 : f32 to vector<8x8xf32>
    %70 = arith.mulf %68, %69 : vector<8x8xf32>
    %71 = vector.extract_strided_slice %67 {offsets = [0, 8], sizes = [8, 8], strides = [1, 1]} : vector<8x24xf32> to vector<8x8xf32>
    %72 = vector.extract_strided_slice %67 {offsets = [0, 16], sizes = [8, 8], strides = [1, 1]} : vector<8x24xf32> to vector<8x8xf32>
    %73 = arith.truncf %70 : vector<8x8xf32> to vector<8x8xbf16>
    %74 = arith.truncf %71 : vector<8x8xf32> to vector<8x8xbf16>
    %cst_26 = arith.constant dense<0.000000e+00> : vector<8x8xf32>
    %75 = tpu.matmul %73, %74, %cst_26 {dimension_numbers = #tpu.dot_dimension_numbers<[1], [1], [0], [0], [0, 0, 1, 0], [], []>} : vector<8x8xbf16>, vector<8x8xbf16>, vector<8x8xf32> -> vector<8x8xf32>
    %76 = vector.broadcast %cst_12 : f32 to vector<8x8xf32>
    %77 = arith.select %29, %75, %76 : vector<8x8xi1>, vector<8x8xf32>
    %cst_27 = arith.constant dense<0xFF800000> : vector<8xf32>
    %78 = vector.multi_reduction <maximumf>, %77, %cst_27 [1] : vector<8x8xf32> to vector<8xf32>
    %79 = vector.shape_cast %78 : vector<8xf32> to vector<8x1xf32>
    %80 = vector.broadcast %79 : vector<8x1xf32> to vector<8x8xf32>
    %81 = arith.subf %77, %80 : vector<8x8xf32>
    %82 = math.exp %81 : vector<8x8xf32>
    %cst_28 = arith.constant dense<0.000000e+00> : vector<8xf32>
    %83 = vector.multi_reduction <add>, %82, %cst_28 [1] : vector<8x8xf32> to vector<8xf32>
    %84 = vector.shape_cast %83 : vector<8xf32> to vector<8x1xf32>
    %85 = arith.truncf %82 : vector<8x8xf32> to vector<8x8xbf16>
    %86 = arith.truncf %72 : vector<8x8xf32> to vector<8x8xbf16>
    %cst_29 = arith.constant dense<0.000000e+00> : vector<8x8xf32>
    %87 = tpu.matmul %85, %86, %cst_29 {dimension_numbers = #tpu.dot_dimension_numbers<[1], [0], [0], [1], [0, 0, 1, 1], [], []>} : vector<8x8xbf16>, vector<8x8xbf16>, vector<8x8xf32> -> vector<8x8xf32>
    %88 = tpu.reciprocal %84 {approx = true} : vector<8x1xf32> -> vector<8x1xf32>
    %89 = vector.broadcast %88 : vector<8x1xf32> to vector<8x8xf32>
    %90 = arith.mulf %87, %89 : vector<8x8xf32>
    %91 = arith.truncf %90 : vector<8x8xf32> to vector<8x8xbf16>
    %92 = arith.index_cast %c1_i32 : i32 to index
    %c0_30 = arith.constant 0 : index
    %c0_31 = arith.constant 0 : index
    %93 = vector.load %arg5[%92, %c0_30, %c0_31] : memref<4x8x32xbf16, #tpu.memory_space<vmem>>, vector<1x8x32xbf16>
    %94 = vector.shape_cast %93 : vector<1x8x32xbf16> to vector<8x32xbf16>
    %cst_32 = arith.constant dense<0.000000e+00> : vector<8x32xf32>
    %95 = tpu.matmul %91, %94, %cst_32 {dimension_numbers = #tpu.dot_dimension_numbers<[1], [0], [0], [1], [0, 0, 1, 1], [], []>} : vector<8x8xbf16>, vector<8x32xbf16>, vector<8x32xf32> -> vector<8x32xf32>
    %96 = arith.addf %63, %95 : vector<8x32xf32>
    %c2_i32 = arith.constant 2 : i32
    %97 = arith.index_cast %c2_i32 : i32 to index
    %c0_33 = arith.constant 0 : index
    %c0_34 = arith.constant 0 : index
    %98 = vector.load %arg4[%97, %c0_33, %c0_34] : memref<4x32x24xbf16, #tpu.memory_space<vmem>>, vector<1x32x24xbf16>
    %99 = vector.shape_cast %98 : vector<1x32x24xbf16> to vector<32x24xbf16>
    %cst_35 = arith.constant dense<0.000000e+00> : vector<8x24xf32>
    %100 = tpu.matmul %26, %99, %cst_35 {dimension_numbers = #tpu.dot_dimension_numbers<[1], [0], [0], [1], [0, 0, 1, 1], [], []>} : vector<8x32xbf16>, vector<32x24xbf16>, vector<8x24xf32> -> vector<8x24xf32>
    %101 = vector.extract_strided_slice %100 {offsets = [0, 0], sizes = [8, 8], strides = [1, 1]} : vector<8x24xf32> to vector<8x8xf32>
    %102 = vector.broadcast %cst_11 : f32 to vector<8x8xf32>
    %103 = arith.mulf %101, %102 : vector<8x8xf32>
    %104 = vector.extract_strided_slice %100 {offsets = [0, 8], sizes = [8, 8], strides = [1, 1]} : vector<8x24xf32> to vector<8x8xf32>
    %105 = vector.extract_strided_slice %100 {offsets = [0, 16], sizes = [8, 8], strides = [1, 1]} : vector<8x24xf32> to vector<8x8xf32>
    %106 = arith.truncf %103 : vector<8x8xf32> to vector<8x8xbf16>
    %107 = arith.truncf %104 : vector<8x8xf32> to vector<8x8xbf16>
    %cst_36 = arith.constant dense<0.000000e+00> : vector<8x8xf32>
    %108 = tpu.matmul %106, %107, %cst_36 {dimension_numbers = #tpu.dot_dimension_numbers<[1], [1], [0], [0], [0, 0, 1, 0], [], []>} : vector<8x8xbf16>, vector<8x8xbf16>, vector<8x8xf32> -> vector<8x8xf32>
    %109 = vector.broadcast %cst_12 : f32 to vector<8x8xf32>
    %110 = arith.select %29, %108, %109 : vector<8x8xi1>, vector<8x8xf32>
    %cst_37 = arith.constant dense<0xFF800000> : vector<8xf32>
    %111 = vector.multi_reduction <maximumf>, %110, %cst_37 [1] : vector<8x8xf32> to vector<8xf32>
    %112 = vector.shape_cast %111 : vector<8xf32> to vector<8x1xf32>
    %113 = vector.broadcast %112 : vector<8x1xf32> to vector<8x8xf32>
    %114 = arith.subf %110, %113 : vector<8x8xf32>
    %115 = math.exp %114 : vector<8x8xf32>
    %cst_38 = arith.constant dense<0.000000e+00> : vector<8xf32>
    %116 = vector.multi_reduction <add>, %115, %cst_38 [1] : vector<8x8xf32> to vector<8xf32>
    %117 = vector.shape_cast %116 : vector<8xf32> to vector<8x1xf32>
    %118 = arith.truncf %115 : vector<8x8xf32> to vector<8x8xbf16>
    %119 = arith.truncf %105 : vector<8x8xf32> to vector<8x8xbf16>
    %cst_39 = arith.constant dense<0.000000e+00> : vector<8x8xf32>
    %120 = tpu.matmul %118, %119, %cst_39 {dimension_numbers = #tpu.dot_dimension_numbers<[1], [0], [0], [1], [0, 0, 1, 1], [], []>} : vector<8x8xbf16>, vector<8x8xbf16>, vector<8x8xf32> -> vector<8x8xf32>
    %121 = tpu.reciprocal %117 {approx = true} : vector<8x1xf32> -> vector<8x1xf32>
    %122 = vector.broadcast %121 : vector<8x1xf32> to vector<8x8xf32>
    %123 = arith.mulf %120, %122 : vector<8x8xf32>
    %124 = arith.truncf %123 : vector<8x8xf32> to vector<8x8xbf16>
    %125 = arith.index_cast %c2_i32 : i32 to index
    %c0_40 = arith.constant 0 : index
    %c0_41 = arith.constant 0 : index
    %126 = vector.load %arg5[%125, %c0_40, %c0_41] : memref<4x8x32xbf16, #tpu.memory_space<vmem>>, vector<1x8x32xbf16>
    %127 = vector.shape_cast %126 : vector<1x8x32xbf16> to vector<8x32xbf16>
    %cst_42 = arith.constant dense<0.000000e+00> : vector<8x32xf32>
    %128 = tpu.matmul %124, %127, %cst_42 {dimension_numbers = #tpu.dot_dimension_numbers<[1], [0], [0], [1], [0, 0, 1, 1], [], []>} : vector<8x8xbf16>, vector<8x32xbf16>, vector<8x32xf32> -> vector<8x32xf32>
    %129 = arith.addf %96, %128 : vector<8x32xf32>
    %c3_i32 = arith.constant 3 : i32
    %130 = arith.index_cast %c3_i32 : i32 to index
    %c0_43 = arith.constant 0 : index
    %c0_44 = arith.constant 0 : index
    %131 = vector.load %arg4[%130, %c0_43, %c0_44] : memref<4x32x24xbf16, #tpu.memory_space<vmem>>, vector<1x32x24xbf16>
    %132 = vector.shape_cast %131 : vector<1x32x24xbf16> to vector<32x24xbf16>
    %cst_45 = arith.constant dense<0.000000e+00> : vector<8x24xf32>
    %133 = tpu.matmul %26, %132, %cst_45 {dimension_numbers = #tpu.dot_dimension_numbers<[1], [0], [0], [1], [0, 0, 1, 1], [], []>} : vector<8x32xbf16>, vector<32x24xbf16>, vector<8x24xf32> -> vector<8x24xf32>
    %134 = vector.extract_strided_slice %133 {offsets = [0, 0], sizes = [8, 8], strides = [1, 1]} : vector<8x24xf32> to vector<8x8xf32>
    %135 = vector.broadcast %cst_11 : f32 to vector<8x8xf32>
    %136 = arith.mulf %134, %135 : vector<8x8xf32>
    %137 = vector.extract_strided_slice %133 {offsets = [0, 8], sizes = [8, 8], strides = [1, 1]} : vector<8x24xf32> to vector<8x8xf32>
    %138 = vector.extract_strided_slice %133 {offsets = [0, 16], sizes = [8, 8], strides = [1, 1]} : vector<8x24xf32> to vector<8x8xf32>
    %139 = arith.truncf %136 : vector<8x8xf32> to vector<8x8xbf16>
    %140 = arith.truncf %137 : vector<8x8xf32> to vector<8x8xbf16>
    %cst_46 = arith.constant dense<0.000000e+00> : vector<8x8xf32>
    %141 = tpu.matmul %139, %140, %cst_46 {dimension_numbers = #tpu.dot_dimension_numbers<[1], [1], [0], [0], [0, 0, 1, 0], [], []>} : vector<8x8xbf16>, vector<8x8xbf16>, vector<8x8xf32> -> vector<8x8xf32>
    %142 = vector.broadcast %cst_12 : f32 to vector<8x8xf32>
    %143 = arith.select %29, %141, %142 : vector<8x8xi1>, vector<8x8xf32>
    %cst_47 = arith.constant dense<0xFF800000> : vector<8xf32>
    %144 = vector.multi_reduction <maximumf>, %143, %cst_47 [1] : vector<8x8xf32> to vector<8xf32>
    %145 = vector.shape_cast %144 : vector<8xf32> to vector<8x1xf32>
    %146 = vector.broadcast %145 : vector<8x1xf32> to vector<8x8xf32>
    %147 = arith.subf %143, %146 : vector<8x8xf32>
    %148 = math.exp %147 : vector<8x8xf32>
    %cst_48 = arith.constant dense<0.000000e+00> : vector<8xf32>
    %149 = vector.multi_reduction <add>, %148, %cst_48 [1] : vector<8x8xf32> to vector<8xf32>
    %150 = vector.shape_cast %149 : vector<8xf32> to vector<8x1xf32>
    %151 = arith.truncf %148 : vector<8x8xf32> to vector<8x8xbf16>
    %152 = arith.truncf %138 : vector<8x8xf32> to vector<8x8xbf16>
    %cst_49 = arith.constant dense<0.000000e+00> : vector<8x8xf32>
    %153 = tpu.matmul %151, %152, %cst_49 {dimension_numbers = #tpu.dot_dimension_numbers<[1], [0], [0], [1], [0, 0, 1, 1], [], []>} : vector<8x8xbf16>, vector<8x8xbf16>, vector<8x8xf32> -> vector<8x8xf32>
    %154 = tpu.reciprocal %150 {approx = true} : vector<8x1xf32> -> vector<8x1xf32>
    %155 = vector.broadcast %154 : vector<8x1xf32> to vector<8x8xf32>
    %156 = arith.mulf %153, %155 : vector<8x8xf32>
    %157 = arith.truncf %156 : vector<8x8xf32> to vector<8x8xbf16>
    %158 = arith.index_cast %c3_i32 : i32 to index
    %c0_50 = arith.constant 0 : index
    %c0_51 = arith.constant 0 : index
    %159 = vector.load %arg5[%158, %c0_50, %c0_51] : memref<4x8x32xbf16, #tpu.memory_space<vmem>>, vector<1x8x32xbf16>
    %160 = vector.shape_cast %159 : vector<1x8x32xbf16> to vector<8x32xbf16>
    %cst_52 = arith.constant dense<0.000000e+00> : vector<8x32xf32>
    %161 = tpu.matmul %157, %160, %cst_52 {dimension_numbers = #tpu.dot_dimension_numbers<[1], [0], [0], [1], [0, 0, 1, 1], [], []>} : vector<8x8xbf16>, vector<8x32xbf16>, vector<8x32xf32> -> vector<8x32xf32>
    %162 = arith.addf %129, %161 : vector<8x32xf32>
    %c4_i32 = arith.constant 4 : i32
    %163 = arith.addf %1, %162 : vector<8x32xf32>
    %c0_53 = arith.constant 0 : index
    %c0_54 = arith.constant 0 : index
    %164 = vector.load %arg6[%c0_53, %c0_54] : memref<1x32xf32, #tpu.memory_space<vmem>>, vector<1x32xf32>
    %165 = vector.broadcast %164 : vector<1x32xf32> to vector<8x32xf32>
    %166 = arith.addf %163, %165 : vector<8x32xf32>
    %c0_55 = arith.constant 0 : index
    %c0_56 = arith.constant 0 : index
    %167 = vector.load %arg7[%c0_55, %c0_56] : memref<1x32xf32, #tpu.memory_space<vmem>>, vector<1x32xf32>
    %c0_57 = arith.constant 0 : index
    %c0_58 = arith.constant 0 : index
    %168 = vector.load %arg8[%c0_57, %c0_58] : memref<1x32xf32, #tpu.memory_space<vmem>>, vector<1x32xf32>
    %cst_59 = arith.constant dense<0.000000e+00> : vector<8xf32>
    %169 = vector.multi_reduction <add>, %166, %cst_59 [1] : vector<8x32xf32> to vector<8xf32>
    %170 = vector.shape_cast %169 : vector<8xf32> to vector<8x1xf32>
    %cst_60 = arith.constant 3.200000e+01 : f32
    %171 = vector.broadcast %cst_60 : f32 to vector<8x1xf32>
    %172 = arith.divf %170, %171 : vector<8x1xf32>
    %173 = vector.broadcast %172 : vector<8x1xf32> to vector<8x32xf32>
    %174 = arith.subf %166, %173 : vector<8x32xf32>
    %175 = arith.mulf %174, %174 : vector<8x32xf32>
    %cst_61 = arith.constant dense<0.000000e+00> : vector<8xf32>
    %176 = vector.multi_reduction <add>, %175, %cst_61 [1] : vector<8x32xf32> to vector<8xf32>
    %177 = vector.shape_cast %176 : vector<8xf32> to vector<8x1xf32>
    %cst_62 = arith.constant 3.200000e+01 : f32
    %178 = vector.broadcast %cst_62 : f32 to vector<8x1xf32>
    %179 = arith.divf %177, %178 : vector<8x1xf32>
    %180 = vector.broadcast %172 : vector<8x1xf32> to vector<8x32xf32>
    %181 = arith.subf %166, %180 : vector<8x32xf32>
    %cst_63 = arith.constant 9.99999974E-6 : f32
    %182 = vector.broadcast %cst_63 : f32 to vector<8x1xf32>
    %183 = arith.addf %179, %182 : vector<8x1xf32>
    %184 = math.rsqrt %183 : vector<8x1xf32>
    %185 = vector.broadcast %184 : vector<8x1xf32> to vector<8x32xf32>
    %186 = arith.mulf %181, %185 : vector<8x32xf32>
    %187 = vector.broadcast %167 : vector<1x32xf32> to vector<8x32xf32>
    %188 = arith.mulf %186, %187 : vector<8x32xf32>
    %189 = vector.broadcast %168 : vector<1x32xf32> to vector<8x32xf32>
    %190 = arith.addf %188, %189 : vector<8x32xf32>
    %191 = arith.truncf %190 : vector<8x32xf32> to vector<8x32xbf16>
    %c0_64 = arith.constant 0 : index
    %c0_65 = arith.constant 0 : index
    %192 = vector.load %arg9[%c0_64, %c0_65] : memref<32x128xbf16, #tpu.memory_space<vmem>>, vector<32x128xbf16>
    %cst_66 = arith.constant dense<0.000000e+00> : vector<8x128xf32>
    %193 = tpu.matmul %191, %192, %cst_66 {dimension_numbers = #tpu.dot_dimension_numbers<[1], [0], [0], [1], [0, 0, 1, 1], [], []>} : vector<8x32xbf16>, vector<32x128xbf16>, vector<8x128xf32> -> vector<8x128xf32>
    %c0_67 = arith.constant 0 : index
    %c0_68 = arith.constant 0 : index
    %194 = vector.load %arg10[%c0_67, %c0_68] : memref<1x128xf32, #tpu.memory_space<vmem>>, vector<1x128xf32>
    %195 = vector.broadcast %194 : vector<1x128xf32> to vector<8x128xf32>
    %196 = arith.addf %193, %195 : vector<8x128xf32>
    %cst_69 = arith.constant 0.000000e+00 : f32
    %197 = vector.broadcast %cst_69 : f32 to vector<8x128xf32>
    %198 = arith.maximumf %196, %197 : vector<8x128xf32>
    %199 = arith.truncf %198 : vector<8x128xf32> to vector<8x128xbf16>
    %c0_70 = arith.constant 0 : index
    %c0_71 = arith.constant 0 : index
    %200 = vector.load %arg11[%c0_70, %c0_71] : memref<128x32xbf16, #tpu.memory_space<vmem>>, vector<128x32xbf16>
    %cst_72 = arith.constant dense<0.000000e+00> : vector<8x32xf32>
    %201 = tpu.matmul %199, %200, %cst_72 {dimension_numbers = #tpu.dot_dimension_numbers<[1], [0], [0], [1], [0, 0, 1, 1], [], []>} : vector<8x128xbf16>, vector<128x32xbf16>, vector<8x32xf32> -> vector<8x32xf32>
    %c0_73 = arith.constant 0 : index
    %c0_74 = arith.constant 0 : index
    %202 = vector.load %arg12[%c0_73, %c0_74] : memref<1x32xf32, #tpu.memory_space<vmem>>, vector<1x32xf32>
    %203 = vector.broadcast %202 : vector<1x32xf32> to vector<8x32xf32>
    %204 = arith.addf %201, %203 : vector<8x32xf32>
    %205 = arith.addf %166, %204 : vector<8x32xf32>
    %c0_75 = arith.constant 0 : index
    %c0_76 = arith.constant 0 : index
    %c0_77 = arith.constant 0 : index
    %206 = vector.load %arg13[%c0_75, %c0_76, %c0_77] : memref<1x8x32xf32, #tpu.memory_space<vmem>>, vector<1x8x32xf32>
    %207 = vector.shape_cast %206 : vector<1x8x32xf32> to vector<8x32xf32>
    %208 = vector.shape_cast %205 : vector<8x32xf32> to vector<1x8x32xf32>
    tpu.vector_store %arg13[%c0_75, %c0_76, %c0_77], %208 {strides = array<i32>} : memref<1x8x32xf32, #tpu.memory_space<vmem>>, vector<1x8x32xf32>,
    return
  }
  func.func @transform_0(%arg0: i32) -> (i32, i32, i32) {
    %c0_i32 = arith.constant 0 : i32
    %c0_i32_0 = arith.constant 0 : i32
    %c0_i32_1 = arith.constant 0 : i32
    return %arg0, %c0_i32, %c0_i32_0 : i32, i32, i32
  }
  func.func @transform_1(%arg0: i32) -> (i32, i32) {
    %c0_i32 = arith.constant 0 : i32
    %c0_i32_0 = arith.constant 0 : i32
    %c0_i32_1 = arith.constant 0 : i32
    return %c0_i32, %c0_i32_0 : i32, i32
  }
  func.func @transform_2(%arg0: i32) -> (i32, i32) {
    %c0_i32 = arith.constant 0 : i32
    %c0_i32_0 = arith.constant 0 : i32
    %c0_i32_1 = arith.constant 0 : i32
    return %c0_i32, %c0_i32_0 : i32, i32
  }
  func.func @transform_3(%arg0: i32) -> (i32, i32, i32) {
    %c0_i32 = arith.constant 0 : i32
    %c0_i32_0 = arith.constant 0 : i32
    %c0_i32_1 = arith.constant 0 : i32
    %c0_i32_2 = arith.constant 0 : i32
    return %c0_i32, %c0_i32_0, %c0_i32_1 : i32, i32, i32
  }
  func.func @transform_4(%arg0: i32) -> (i32, i32, i32) {
    %c0_i32 = arith.constant 0 : i32
    %c0_i32_0 = arith.constant 0 : i32
    %c0_i32_1 = arith.constant 0 : i32
    %c0_i32_2 = arith.constant 0 : i32
    return %c0_i32, %c0_i32_0, %c0_i32_1 : i32, i32, i32
  }
  func.func @transform_5(%arg0: i32) -> (i32, i32) {
    %c0_i32 = arith.constant 0 : i32
    %c0_i32_0 = arith.constant 0 : i32
    %c0_i32_1 = arith.constant 0 : i32
    return %c0_i32, %c0_i32_0 : i32, i32
  }
  func.func @transform_6(%arg0: i32) -> (i32, i32) {
    %c0_i32 = arith.constant 0 : i32
    %c0_i32_0 = arith.constant 0 : i32
    %c0_i32_1 = arith.constant 0 : i32
    return %c0_i32, %c0_i32_0 : i32, i32
  }
  func.func @transform_7(%arg0: i32) -> (i32, i32) {
    %c0_i32 = arith.constant 0 : i32
    %c0_i32_0 = arith.constant 0 : i32
    %c0_i32_1 = arith.constant 0 : i32
    return %c0_i32, %c0_i32_0 : i32, i32
  }
  func.func @transform_8(%arg0: i32) -> (i32, i32) {
    %c0_i32 = arith.constant 0 : i32
    %c0_i32_0 = arith.constant 0 : i32
    %c0_i32_1 = arith.constant 0 : i32
    return %c0_i32, %c0_i32_0 : i32, i32
  }
  func.func @transform_9(%arg0: i32) -> (i32, i32) {
    %c0_i32 = arith.constant 0 : i32
    %c0_i32_0 = arith.constant 0 : i32
    %c0_i32_1 = arith.constant 0 : i32
    return %c0_i32, %c0_i32_0 : i32, i32
  }
  func.func @transform_10(%arg0: i32) -> (i32, i32) {
    %c0_i32 = arith.constant 0 : i32
    %c0_i32_0 = arith.constant 0 : i32
    %c0_i32_1 = arith.constant 0 : i32
    return %c0_i32, %c0_i32_0 : i32, i32
  }
  func.func @transform_11(%arg0: i32) -> (i32, i32) {
    %c0_i32 = arith.constant 0 : i32
    %c0_i32_0 = arith.constant 0 : i32
    %c0_i32_1 = arith.constant 0 : i32
    return %c0_i32, %c0_i32_0 : i32, i32
  }
  func.func @transform_12(%arg0: i32) -> (i32, i32, i32) {
    %c0_i32 = arith.constant 0 : i32
    %c0_i32_0 = arith.constant 0 : i32
    %c0_i32_1 = arith.constant 0 : i32
    return %arg0, %c0_i32, %c0_i32_0 : i32, i32, i32
  }
}

</mosaic_0001>

<bundles_post_ra>
// kernel: tpu_custom_call.1
= control target key start
LH: loop header
LB: loop body
LE: loop exit
PB: predicated region body
PF: predicated region fallthrough
CT: control target
= control target key end

     0   :  { %s2424_s0 = inlined_call_operand.vmem [shape: f32[2,8,32], index: 0, kind: input, shape index: {}]   ;;  %s2425_s1 = inlined_call_operand.vmem [shape: f32[1,32], index: 1, kind: input, shape index: {}]   ;;  %s2426_s2 = inlined_call_operand.vmem [shape: f32[1,32], index: 2, kind: input, shape index: {}]   ;;  %s2427_s3 = inlined_call_operand.vmem [shape: bf16[4,32,24], index: 3, kind: input, shape index: {}]   ;;  %s2428_s4 = inlined_call_operand.vmem [shape: bf16[4,8,32], index: 4, kind: input, shape index: {}]   ;;  %s2429_s5 = inlined_call_operand.vmem [shape: f32[1,32], index: 5, kind: input, shape index: {}]   ;;  %s2430_s6 = inlined_call_operand.vmem [shape: f32[1,32], index: 6, kind: input, shape index: {}]   ;;  %s2431_s7 = inlined_call_operand.vmem [shape: f32[1,32], index: 7, kind: input, shape index: {}]   ;;  %s2432_s8 = inlined_call_operand.vmem [shape: bf16[32,128], index: 8, kind: input, shape index: {}]   ;;  %s2433_s9 = inlined_call_operand.vmem [shape: f32[1,128], index: 9, kind: input, shape index: {}]   ;;  %s2434_s10 = inlined_call_operand.vmem [shape: bf16[128,32], index: 10, kind: input, shape index: {}]   ;;  %s2435_s11 = inlined_call_operand.vmem [shape: f32[1,32], index: 11, kind: input, shape index: {}]   ;;  %s2436_s12 = inlined_call_operand.hbm [shape: f32[2,8,32], index: 12, kind: output, shape index: {}]  }
   0x1   :  { %2437 = sst [smem:[#allocation5_spill]] %s2424_s0 }
   0x2   :  { %2438 = sst [smem:[#allocation6_spill]] %s2425_s1 }
   0x3   :  { %17 = vsyncpa [#allocation3], 0 }
   0x4   :  { %19 = vsyncpa [#allocation3 + $0x1], 0  ;;  %s2084_s21 = smov 0   ;;  %s2086_s22 = smov 0  }
   0x5   :  { %s2088_s23 = smov 0   ;;  %s2090_s24 = smov 0  }
   0x6 LB: > { %s2105_s25 = sadd.s32 4294967295, %s2012_s24   ;;  %s1622_s26 = sadd.s32 4294967294, %s2012_s24   ;;  %s2012_s24 = sphi %s2090_s24, %s2446_s24   ;;  %s2008_s23 = sphi %s2088_s23, %s2445_s23   ;;  %s2004_s22 = sphi %s2086_s22, %s2444_s22   ;;  %s2000_s21 = sphi %s2084_s21, %s2443_s21  }
   0x7   : > { %s2109_s27 = sadd.s32 1, %s2012_s24   ;;  %s289_s28 = sadd.s32 1, %s2008_s23 }
   0x8   : > { %s286_s29 = ssub.s32 %s2012_s24, %s2109_s27  ;;  %p299_p0 = scmp.ne.s32.totalorder %s2008_s23, %s2004_s22 }
   0x9   : > { %p287_p1 = scmp.eq.s32.totalorder %s286_s29, 0  ;;  %p300_p2 = scmp.eq.s32.totalorder %s2105_s25, 1 }
   0xa   : > { %p305_p3 = scmp.ne.s32.totalorder %s2004_s22, %s2000_s21  ;;  %p306_p4 = scmp.eq.s32.totalorder %s1622_s26, 1 }
   0xb   : > { %s2120_s30 = scalar_select %p287_p1, %s2008_s23, %s289_s28  }
   0xc   : > { %p2122_p5 = por %p300_p2, %p299_p0  ;;  %p2126_p6 = por %p306_p4, %p305_p3 }
   0xd   : > { %p1625_p7 = scmp.ge.s32.totalorder %s2012_s24, 1  ;;  %p364_p8 = scmp.lt.s32.totalorder %s2012_s24, 3 }
   0xf   : > { %p365_p9 = pnand %p1625_p7, %p364_p8 }
  0x10   : > { %p405_p10 = scmp.lt.s32.totalorder (!%p365_p9), %s2105_s25, 1  ;;  %vm413_vm0 = vcmask (!%p365_p9), 261120   ;;  %s2441_s0 = sld [smem:[#allocation5_spill]] (!%p365_p9)  ;;  %v1912_v7 = vld [vmem:[%s2427_s3] sm:$0xff] (!%p365_p9)   ;;  %v1913_v8 = vld [vmem:[%s2427_s3 + $0x10] sm:$0xff] (!%p365_p9)   ;;  %v2014_v9 = vmov (!%p365_p9), 0.0   ;;  %v443_v38 = vlaneseq (!%p365_p9) }
  0x11   : > { %368 = sbr.rel (%p365_p9) target bundleno = 4284 (0x10bc), region = 68  ;;  %1737 = vmatprep.subr.bf16.mxu0 (!%p365_p9), %v2014_v9  ;;  %1757 = vmatprep.subr.bf16.mxu1 (!%p365_p9), %v2014_v9  ;;  %v1914_v10 = vld [vmem:[%s2427_s3 + $0x8] sm:$0xff] (!%p365_p9)   ;;  %v1915_v11 = vld [vmem:[%s2427_s3 + $0x18] sm:$0xff] (!%p365_p9)   ;;  %vm2015_vm1 = vmmov (!%p365_p9), 0   ;;  %s2442_s1 = sld [smem:[#allocation6_spill]] (!%p365_p9)  ;;  %vm513_vm2 = vcmask (!%p365_p9), 64512  }
  0x12   : > { %1738 = vmatpush3.bf16.msra.mxu0 (!%p365_p9), %v1912_v7  ;;  %1758 = vmatpush3.bf16.msra.mxu1 (!%p365_p9), %v1913_v8  ;;  %v1629_v18 = vld [vmem:[%s2426_s2] ss:$0 sm:$0xff] (!%p365_p9)  ;;  %s2016_s29 = smov (!%p365_p9), 112   ;;  %vm576_vm3 = vcmask (!%p365_p9), 1043456   ;;  %v2191_v39 = vshrl.u32 (!%p365_p9), %v443_v38, 7  ;;  %v2193_v40 = vand.u32 (!%p365_p9), 127, %v443_v38 }
  0x13   : > { %1739 = vmatprep.subr.bf16.mxu0 (!%p365_p9), %v2014_v9  ;;  %1759 = vmatprep.subr.bf16.mxu1 (!%p365_p9), %v2014_v9  ;;  %s402_s17 = sand.u32 (!%p365_p9), 1, %s2004_s22   ;;  %s1686_s26 = sshll.u32 (!%p365_p9), %s2105_s25, 7 }
  0x14   : > { %1741 = vmatprep.mubr.msk.bf16.mxu0 (!%p365_p9), %vm2015_vm1, %v2014_v9  ;;  %1761 = vmatprep.mubr.msk.bf16.mxu1 (!%p365_p9), %vm2015_vm1, %v2014_v9  ;;  %vm447_vm4 = vcmp.ge.s32.totalorder (!%p365_p9), %v2191_v39, %v2193_v40  ;;  %v1667_v39 = vld [vmem:[%s2428_s4 + $0xc] sm:$0xf] (!%p365_p9)  ;;  %s1626_s18 = sshll.u32 (!%p365_p9), %s402_s17, 3 }
  0x15   : > { %v1286_v40 = vsel (!%p365_p9), %vm576_vm3, %v1667_v39, 0  ;;  %s404_s28 = scalar_lea.vmem (!%p365_p9), [#allocation2], %s1626_s18 }
  0x16   : > { %1740 = vmatpush3.bf16.msra.mxu0 (!%p365_p9), %v1914_v10  ;;  %1760 = vmatpush3.bf16.msra.mxu1 (!%p365_p9), %v1915_v11  ;;  %v623_v11 = vld [vmem:[%s2428_s4] sm:$0xf] (!%p365_p9) }
  0x17   : > { %1745 = vmatprep.subr.bf16.mxu0 (!%p365_p9), %v2014_v9  ;;  %1771 = vmatprep.subr.bf16.mxu1 (!%p365_p9), %v2014_v9  ;;  %v1628_v16 = vld [vmem:[%s2442_s1] ss:$0 sm:$0xff] (!%p365_p9) }
  0x18   : > { %s406_s15 = scalar_select %p405_p10, %s2105_s25, 1 }
  0x19   : > { %s1550_s25 = scalar_lea.sflag [#allocation3], %s402_s17 }
  0x1a   : > { %s1627_s16 = sshll.u32 %s406_s15, 3  ;;  %s2017_s15 = smov 120  }
  0x1b   : > { %s408_s19 = scalar_lea.vmem %s2441_s0, %s1627_s16  ;;  %s2381_s0 = scalar_lea.hbm %s2436_s12, %s1686_s26 }
  0x1c   : > { %v2137_v0 = vld [vmem:[%s408_s19] sm:$0xff]  ;;  %s2018_s19 = smov [#allocation2]  }
  0x1d   : > { %v414_v1 = vsel %vm413_vm0, %v2137_v0, 0.0  ;;  %s1954_s20 = sshll.u32 %s2018_s19, 4  ;;  %s1955_s20 = int_to_ptr.vmem [resolvable:$false] %s1954_s20 }
  0x1e   : > { %415 = vadd.xlane.f32.xlu0 %v414_v1  ;;  %s1956_s1 = scalar_lea.vmem %s1955_s20, 256 }
  0xab   : > { %v416_v2 = vpop.xlane.xlu0 %415 }
  0xac   : > { %v418_v3 = vmul.f32 0.03125, %v416_v2 }
  0xae   : > { %v419_v4 = vsub.f32 %v2137_v0, %v418_v3 }
  0xb0   : > { %v420_v5 = vmul.f32 %v419_v4, %v419_v4 }
  0xb2   : > { %v421_v6 = vsel %vm413_vm0, %v420_v5, 0.0 }
  0xb3   : > { %422 = vadd.xlane.f32.xlu0 %v421_v6 }
 0x140   : > { %v423_v12 = vpop.xlane.xlu0 %422 }
 0x141   : > { %v424_v13 = vmul.f32 0.03125, %v423_v12 }
 0x143   : > { %v425_v14 = vadd.f32 1e-05, %v424_v13 }
 0x145   : > { %1930 = vrsqrt.f32 %v425_v14 }
 0x14f   : > { %v1931_v15 = vpop.eup %1930 }
 0x150   : > { %v427_v17 = vmul.f32 %v1931_v15, %v419_v4  ;;  %v847_v15 = vsel %vm576_vm3, %v623_v11, 0 }
 0x152   : > { %v434_v19 = vmul.f32 %v1628_v16, %v427_v17 }
 0x154   : > { %v441_v20 = vadd.f32 %v1629_v18, %v434_v19  ;;  %v1644_v19 = vld [vmem:[%s2428_s4 + $0x4] sm:$0xf] }
 0x156   : > { %v2171_v21 = vpack.c.bf16 %v441_v20, %v441_v20  ;;  %v801_v20 = vsel %vm576_vm3, %v1644_v19, 0 }
 0x158   : > { %1742 = vmatmul.mubr.msk.bf16.vlgmr.msra.gmra.mrb[0].mxu0 %vm413_vm0, %v2171_v21  ;;  %1762 = vmatmul.mubr.msk.bf16.vlgmr.msra.gmra.mrb[0].mxu1 %vm413_vm0, %v2171_v21 }
 0x159   : > { %1747 = vmatprep.mubr.msk.bf16.mxu0 %vm2015_vm1, %v2014_v9  ;;  %1773 = vmatprep.mubr.msk.bf16.mxu1 %vm2015_vm1, %v2014_v9 }
 0x22b   : > { %v501_v22 = vpop.f32.mrb[0].mxu0  ;;  %v675_v23 = vpop.f32.mrb[0].mxu1 }
 0x22c   : > { %v509_v24 = vpack.c.bf16 %v501_v22, %v501_v22  ;;  %v1743_v25 = vpop.f32.mrb[1].mxu0  ;;  %v1763_v26 = vpop.f32.mrb[1].mxu1  ;;  %v683_v31 = vpack.c.bf16 %v675_v23, %v675_v23  ;;  %v507_v34 = vmul.f32 0.35355338, %v501_v22  ;;  %v681_v56 = vmul.f32 0.35355338, %v675_v23 }
 0x22d   : > { %v504_v27 = vpop.f32.mrb[2].mxu0  ;;  %v678_v28 = vpop.f32.mrb[2].mxu1 }
 0x22e   : > { %v1764_v29 = vpop.f32.mrb[3].mxu1  ;;  %571 = vrot.lane.b32.xlu0 %v509_v24, %s2016_s29  ;;  %511 = vrot.lane.b32.xlu1 %v509_v24, %s2017_s15  ;;  %v1744_v30 = vpop.f32.mrb[3].mxu0  ;;  %v508_v36 = vpack.c.bf16 %v507_v34, %v507_v34  ;;  %v682_v57 = vpack.c.bf16 %v681_v56, %v681_v56  ;;  %v1916_v28 = vld [vmem:[%s2427_s3 + $0x20] sm:$0xff]  }
 0x232   : > { %685 = vrot.lane.b32.xlu0 %v683_v31, %s2017_s15 }
 0x2a0   : > { %v512_v32 = vpop.permute.xlu1 %511  ;;  %v572_v35 = vpop.permute.xlu0 %571 }
 0x2a1   : > { %v518_v33 = vsel %vm513_vm2, %v512_v32, 0  ;;  %v578_v37 = vsel %vm576_vm3, %v572_v35, 0 }
 0x2a2   : > { %1746 = vmatpush3.bf16.xpose.msra.mxu0 %v518_v33 }
 0x2a3   : > { %1751 = vmatprep.subr.bf16.mxu0 %v2014_v9 }
 0x2a4   : > { %v686_v53 = vpop.permute.xlu0 %685 }
 0x2a5   : > { %v691_v55 = vsel %vm513_vm2, %v686_v53, 0 }
 0x2a9   : > { %1748 = vmatmul.mubr.msk.bf16.vlgmr.msra.gmra.mrb[4].mxu0 %vm513_vm2, %v508_v36 }
 0x2aa   : > { %1752 = vmatpush3.bf16.msra.mxu0 %v578_v37  ;;  %1753 = vmatprep.mubr.msk.bf16.mxu0 %vm2015_vm1, %v2014_v9 }
 0x2ab   : > { %1765 = vmatprep.subr.bf16.mxu0 %v2014_v9 }
 0x37c   : > { %v554_v41 = vpop.f32.mrb[4].mxu0 }
 0x37d   : > { %v560_v42 = vsel %vm447_vm4, %v554_v41, -1e+30  ;;  %v1749_v43 = vpop.f32.mrb[5].mxu0 }
 0x37e   : > { %v557_v44 = vpop.f32.mrb[6].mxu0  ;;  %v561_v45 = vsel %vm513_vm2, %v560_v42, -inf }
 0x37f   : > { %562 = vmax.xlane.f32.xlu1 %v561_v45  ;;  %v1750_v46 = vpop.f32.mrb[7].mxu0 }
 0x390   : > { %744 = vrot.lane.b32.xlu1 %v683_v31, %s2016_s29  ;;  %v1917_v31 = vld [vmem:[%s2427_s3 + $0x28] sm:$0xff]  }
 0x40c   : > { %v563_v47 = vpop.xlane.xlu1 %562 }
 0x40d   : > { %v564_v48 = vsub.f32 %v560_v42, %v563_v47 }
 0x40f   : > { %v565_v49 = vmul.f32 1.442695, %v564_v48 }
 0x410   : > { %v745_v50 = vpop.permute.xlu1 %744 }
 0x411   : > { %1932 = vpow2.f32 %v565_v49  ;;  %v750_v51 = vsel %vm576_vm3, %v745_v50, 0 }
 0x412   : > { %1772 = vmatpush3.bf16.msra.mxu1 %v750_v51 }
 0x413   : > { %1783 = vmatprep.subr.bf16.mxu1 %v2014_v9 }
 0x41b   : > { %v1933_v52 = vpop.eup %1932 }
 0x41c   : > { %v570_v54 = vpack.c.bf16 %v1933_v52, %v1933_v52  ;;  %v567_v5 = vsel %vm513_vm2, %v1933_v52, 0.0 }
 0x41e   : > { %1754 = vmatmul.mubr.msk.bf16.vlgmr.msra.gmra.mrb[8].mxu0 %vm513_vm2, %v570_v54 }
 0x41f   : > { %1766 = vmatpush3.bf16.xpose.msra.mxu0 %v691_v55  ;;  %1767 = vmatprep.mubr.msk.bf16.mxu0 %vm2015_vm1, %v2014_v9 }
 0x420   : > { %1777 = vmatprep.subr.bf16.mxu0 %v2014_v9 }
 0x426   : > { %1768 = vmatmul.mubr.msk.bf16.vlgmr.msra.gmra.mrb[12].mxu0 %vm513_vm2, %v682_v57 }
 0x427   : > { %1779 = vmatprep.mubr.msk.bf16.mxu0 %vm2015_vm1, %v2014_v9  ;;  %1778 = vmatpush3.bf16.msra.mxu0 %v801_v20 }
 0x428   : > { %1789 = vmatprep.subr.bf16.mxu0 %v2014_v9 }
 0x4f1   : > { %v614_v58 = vpop.f32.mrb[8].mxu0 }
 0x4f2   : > { %v1755_v59 = vpop.f32.mrb[9].mxu0 }
 0x4f3   : > { %v617_v60 = vpop.f32.mrb[10].mxu0 }
 0x4f4   : > { %v1756_v61 = vpop.f32.mrb[11].mxu0 }
 0x4f9   : > { %v727_v62 = vpop.f32.mrb[12].mxu0 }
 0x4fa   : > { %v733_v63 = vsel %vm447_vm4, %v727_v62, -1e+30  ;;  %v1769_v1 = vpop.f32.mrb[13].mxu0 }
 0x4fb   : > { %v730_v2 = vpop.f32.mrb[14].mxu0  ;;  %v734_v3 = vsel %vm513_vm2, %v733_v63, -inf  ;;  %v1918_v1 = vld [vmem:[%s2427_s3 + $0x30] sm:$0xff]  }
 0x4fc   : > { %735 = vmax.xlane.f32.xlu0 %v734_v3  ;;  %v1770_v4 = vpop.f32.mrb[15].mxu0 }
 0x4fd   : > { %v1919_v4 = vld [vmem:[%s2427_s3 + $0x38] sm:$0xff]  }
 0x500   : > { %568 = vadd.xlane.f32.xlu0 %v567_v5  ;;  %v1656_v5 = vld [vmem:[%s2428_s4 + $0x8] sm:$0xf] }
 0x589   : > { %v736_v6 = vpop.xlane.xlu0 %735 }
 0x58a   : > { %v737_v7 = vsub.f32 %v733_v63, %v736_v6  ;;  %v1066_v6 = vsel %vm576_vm3, %v1656_v5, 0  ;;  %v1920_v5 = vld [vmem:[%s2432_s8] sm:$0xff]  }
 0x58c   : > { %v738_v8 = vmul.f32 1.442695, %v737_v7 }
 0x58d   : > { %v569_v10 = vpop.xlane.xlu0 %568 }
 0x58e   : > { %1934 = vpow2.f32 %v738_v8 }
 0x58f   : > { %1936 = vrcp.f32 %v569_v10 }
 0x598   : > { %v1935_v12 = vpop.eup %1934 }
 0x599   : > { %v740_v13 = vsel %vm513_vm2, %v1935_v12, 0.0  ;;  %v743_v14 = vpack.c.bf16 %v1935_v12, %v1935_v12  ;;  %v1937_v16 = vpop.eup %1936 }
 0x59a   : > { %741 = vadd.xlane.f32.xlu1 %v740_v13  ;;  %v621_v17 = vmul.f32 %v1937_v16, %v614_v58 }
 0x59b   : > { %1774 = vmatmul.mubr.msk.bf16.vlgmr.msra.gmra.mrb[4].mxu1 %vm513_vm2, %v743_v14 }
 0x59c   : > { %1784 = vmatpush3.bf16.msra.mxu1 %v847_v15  ;;  %1785 = vmatprep.mubr.msk.bf16.mxu1 %vm2015_vm1, %v2014_v9  ;;  %v622_v18 = vpack.c.bf16 %v621_v17, %v621_v17 }
 0x59d   : > { %1797 = vmatprep.subr.bf16.mxu1 %v2014_v9 }
 0x5a3   : > { %1786 = vmatmul.mubr.msk.bf16.vlgmr.msra.gmra.mrb[8].mxu1 %vm513_vm2, %v622_v18 }
 0x5a4   : > { %1799 = vmatprep.mubr.msk.bf16.mxu1 %vm2015_vm1, %v2014_v9 }
 0x627   : > { %v742_v22 = vpop.xlane.xlu1 %741 }
 0x628   : > { %1938 = vrcp.f32 %v742_v22 }
 0x632   : > { %v1939_v23 = vpop.eup %1938 }
 0x66e   : > { %v786_v24 = vpop.f32.mrb[4].mxu1 }
 0x66f   : > { %v793_v25 = vmul.f32 %v1939_v23, %v786_v24  ;;  %v1775_v26 = vpop.f32.mrb[5].mxu1 }
 0x670   : > { %v789_v27 = vpop.f32.mrb[6].mxu1 }
 0x671   : > { %v794_v29 = vpack.c.bf16 %v793_v25, %v793_v25  ;;  %v1776_v30 = vpop.f32.mrb[7].mxu1 }
 0x673   : > { %1780 = vmatmul.mubr.msk.bf16.vlgmr.msra.gmra.mrb[16].mxu0 %vm513_vm2, %v794_v29 }
 0x674   : > { %1790 = vmatpush3.bf16.msra.mxu0 %v1916_v28  ;;  %1793 = vmatprep.mubr.msk.bf16.mxu0 %vm2015_vm1, %v2014_v9 }
 0x675   : > { %1791 = vmatprep.subr.bf16.mxu0 %v2014_v9 }
 0x676   : > { %v883_v32 = vpop.f32.mrb[8].mxu1 }
 0x677   : > { %v1787_v33 = vpop.f32.mrb[9].mxu1 }
 0x678   : > { %v886_v34 = vpop.f32.mrb[10].mxu1  ;;  %1792 = vmatpush3.bf16.msra.mxu0 %v1917_v31 }
 0x679   : > { %v1788_v35 = vpop.f32.mrb[11].mxu1  ;;  %1803 = vmatprep.subr.bf16.mxu0 %v2014_v9 }
 0x67b   : > { %1794 = vmatmul.mubr.msk.bf16.vlgmr.msra.gmra.mrb[20].mxu0 %vm413_vm0, %v2171_v21 }
 0x67c   : > { %1805 = vmatprep.mubr.msk.bf16.mxu0 %vm2015_vm1, %v2014_v9 }
 0x746   : > { %v837_v36 = vpop.f32.mrb[16].mxu0 }
 0x747   : > { %v2249_v37 = vadd.f32 %v883_v32, %v837_v36  ;;  %v1781_v38 = vpop.f32.mrb[17].mxu0 }
 0x748   : > { %v840_v41 = vpop.f32.mrb[18].mxu0 }
 0x749   : > { %v1782_v42 = vpop.f32.mrb[19].mxu0 }
 0x74e   : > { %v940_v43 = vpop.f32.mrb[20].mxu0 }
 0x74f   : > { %v948_v44 = vpack.c.bf16 %v940_v43, %v940_v43  ;;  %v1795_v45 = vpop.f32.mrb[21].mxu0  ;;  %v946_v52 = vmul.f32 0.35355338, %v940_v43 }
 0x750   : > { %v943_v46 = vpop.f32.mrb[22].mxu0 }
 0x751   : > { %1009 = vrot.lane.b32.xlu1 %v948_v44, %s2016_s29  ;;  %950 = vrot.lane.b32.xlu0 %v948_v44, %s2017_s15  ;;  %v1796_v47 = vpop.f32.mrb[23].mxu0  ;;  %v947_v53 = vpack.c.bf16 %v946_v52, %v946_v52 }
 0x7c3   : > { %v1010_v48 = vpop.permute.xlu1 %1009  ;;  %v951_v49 = vpop.permute.xlu0 %950 }
 0x7c4   : > { %v1015_v50 = vsel %vm576_vm3, %v1010_v48, 0  ;;  %v956_v51 = vsel %vm513_vm2, %v951_v49, 0 }
 0x7c5   : > { %1798 = vmatpush3.bf16.xpose.msra.mxu1 %v956_v51  ;;  %1804 = vmatpush3.bf16.msra.mxu0 %v1015_v50 }
 0x7c6   : > { %1815 = vmatprep.subr.bf16.mxu0 %v2014_v9  ;;  %1809 = vmatprep.subr.bf16.mxu1 %v2014_v9 }
 0x7cc   : > { %1800 = vmatmul.mubr.msk.bf16.vlgmr.msra.gmra.mrb[12].mxu1 %vm513_vm2, %v947_v53 }
 0x7cd   : > { %1811 = vmatprep.mubr.msk.bf16.mxu1 %vm2015_vm1, %v2014_v9  ;;  %1810 = vmatpush3.bf16.msra.mxu1 %v1066_v6  ;;  %v1922_v6 = vld [vmem:[%s2434_s10] sm:$0xff]  }
 0x7ce   : > { %1823 = vmatprep.subr.bf16.mxu1 %v2014_v9 }
 0x89f   : > { %v992_v54 = vpop.f32.mrb[12].mxu1 }
 0x8a0   : > { %v998_v55 = vsel %vm447_vm4, %v992_v54, -1e+30  ;;  %v1801_v56 = vpop.f32.mrb[13].mxu1 }
 0x8a1   : > { %v995_v57 = vpop.f32.mrb[14].mxu1  ;;  %v999_v58 = vsel %vm513_vm2, %v998_v55, -inf }
 0x8a2   : > { %1000 = vmax.xlane.f32.xlu0 %v999_v58  ;;  %v1802_v59 = vpop.f32.mrb[15].mxu1  ;;  %v1669_v57 = vld [vmem:[%s2429_s5] ss:$0 sm:$0xff] }
 0x92f   : > { %v1001_v60 = vpop.xlane.xlu0 %1000 }
 0x930   : > { %v1002_v61 = vsub.f32 %v998_v55, %v1001_v60 }
 0x932   : > { %v1003_v62 = vmul.f32 1.442695, %v1002_v61 }
 0x934   : > { %1940 = vpow2.f32 %v1003_v62 }
 0x93e   : > { %v1941_v63 = vpop.eup %1940 }
 0x93f   : > { %v1005_v2 = vsel %vm513_vm2, %v1941_v63, 0.0  ;;  %v1008_v3 = vpack.c.bf16 %v1941_v63, %v1941_v63 }
 0x940   : > { %1006 = vadd.xlane.f32.xlu1 %v1005_v2 }
 0x941   : > { %1806 = vmatmul.mubr.msk.bf16.vlgmr.msra.gmra.mrb[24].mxu0 %vm513_vm2, %v1008_v3 }
 0x942   : > { %1816 = vmatpush3.bf16.msra.mxu0 %v1918_v1  ;;  %1819 = vmatprep.mubr.msk.bf16.mxu0 %vm2015_vm1, %v2014_v9 }
 0x943   : > { %1817 = vmatprep.subr.bf16.mxu0 %v2014_v9 }
 0x946   : > { %1818 = vmatpush3.bf16.msra.mxu0 %v1919_v4 }
 0x947   : > { %1829 = vmatprep.subr.bf16.mxu0 %v2014_v9 }
 0x949   : > { %1820 = vmatmul.mubr.msk.bf16.vlgmr.msra.gmra.mrb[28].mxu0 %vm413_vm0, %v2171_v21 }
 0x94a   : > { %1831 = vmatprep.mubr.msk.bf16.mxu0 %vm2015_vm1, %v2014_v9 }
 0x9cd   : > { %v1007_v7 = vpop.xlane.xlu1 %1006 }
 0x9ce   : > { %1942 = vrcp.f32 %v1007_v7  ;;  %v1923_v7 = vld [vmem:[%s2434_s10 + $0x8] sm:$0xff]  }
 0x9d8   : > { %v1943_v8 = vpop.eup %1942 }
 0xa14   : > { %v1051_v10 = vpop.f32.mrb[24].mxu0 }
 0xa15   : > { %v1058_v11 = vmul.f32 %v1943_v8, %v1051_v10  ;;  %v1807_v12 = vpop.f32.mrb[25].mxu0  ;;  %v1924_v8 = vld [vmem:[%s2434_s10 + $0x10] sm:$0xff]   ;;  %v1925_v10 = vld [vmem:[%s2434_s10 + $0x18] sm:$0xff]  }
 0xa16   : > { %v1054_v13 = vpop.f32.mrb[26].mxu0  ;;  %v1927_v12 = vld [vmem:[%s2434_s10 + $0x28] sm:$0xff]  }
 0xa17   : > { %v1059_v21 = vpack.c.bf16 %v1058_v11, %v1058_v11  ;;  %v1808_v14 = vpop.f32.mrb[27].mxu0  ;;  %v1926_v11 = vld [vmem:[%s2434_s10 + $0x20] sm:$0xff]  }
 0xa19   : > { %1812 = vmatmul.mubr.msk.bf16.vlgmr.msra.gmra.mrb[16].mxu1 %vm513_vm2, %v1059_v21 }
 0xa1a   : > { %1825 = vmatprep.mubr.msk.bf16.mxu1 %vm2015_vm1, %v2014_v9 }
 0xa1c   : > { %v1160_v15 = vpop.f32.mrb[28].mxu0 }
 0xa1d   : > { %v1168_v16 = vpack.c.bf16 %v1160_v15, %v1160_v15  ;;  %v1821_v17 = vpop.f32.mrb[29].mxu0  ;;  %v1166_v25 = vmul.f32 0.35355338, %v1160_v15 }
 0xa1e   : > { %v1163_v18 = vpop.f32.mrb[30].mxu0 }
 0xa1f   : > { %1229 = vrot.lane.b32.xlu1 %v1168_v16, %s2016_s29  ;;  %1170 = vrot.lane.b32.xlu0 %v1168_v16, %s2017_s15  ;;  %v1822_v19 = vpop.f32.mrb[31].mxu0  ;;  %v1167_v26 = vpack.c.bf16 %v1166_v25, %v1166_v25  ;;  %v1670_v16 = vld [vmem:[%s2430_s6] ss:$0 sm:$0xff]  ;;  %s1563_s29 = sshll.u32 %s404_s28, 4  ;;  %s2383_s29 = int_to_ptr.vmem [resolvable:$true] %s1563_s29 }
 0xa20   : > { %v1671_v18 = vld [vmem:[%s2431_s7] ss:$0 sm:$0xff]  ;;  %s1950_s18 = scalar_lea.vmem %s2383_s29, 128  ;;  %p1957_p0 = scmp.lt.s32.totalorder %s2383_s29, %s1955_s20 }
 0xa21   : > { %v1672_v25 = vld [vmem:[%s2433_s9] ss:$0 sm:$0xff]  ;;  %p1951_p11 = scmp.ne.s32.totalorder %s2383_s29, %s1950_s18  ;;  %p1958_p1 = scmp.lt.s32.totalorder %s1956_s1, %s1950_s18 }
 0xa23   : > { %p1952_p12 = pnand %p1951_p11, %p2122_p5  ;;  %p1959_p2 = por %p1958_p1, %p1957_p0 }
 0xa25   : > { %p1953_p13 = pneg %p1952_p12 }
 0xa27   : > { %p1960_p3 = pnand %p1959_p2, %p1953_p13 }
 0xa91   : > { %v1230_v20 = vpop.permute.xlu1 %1229  ;;  %v1171_v22 = vpop.permute.xlu0 %1170 }
 0xa92   : > { %v1235_v23 = vsel %vm576_vm3, %v1230_v20, 0  ;;  %v1176_v24 = vsel %vm513_vm2, %v1171_v22, 0 }
 0xa93   : > { %1824 = vmatpush3.bf16.xpose.msra.mxu1 %v1176_v24  ;;  %1830 = vmatpush3.bf16.msra.mxu0 %v1235_v23  ;;  %v1928_v23 = vld [vmem:[%s2434_s10 + $0x30] sm:$0xff]   ;;  %v1929_v24 = vld [vmem:[%s2434_s10 + $0x38] sm:$0xff]  }
 0xa94   : > { %1835 = vmatprep.subr.bf16.mxu1 %v2014_v9  ;;  %1841 = vmatprep.subr.bf16.mxu0 %v2014_v9 }
 0xa9a   : > { %1826 = vmatmul.mubr.msk.bf16.vlgmr.msra.gmra.mrb[20].mxu1 %vm513_vm2, %v1167_v26 }
 0xa9b   : > { %1837 = vmatprep.mubr.msk.bf16.mxu1 %vm2015_vm1, %v2014_v9  ;;  %1836 = vmatpush3.bf16.msra.mxu1 %v1286_v40 }
 0xa9c   : > { %1849 = vmatprep.subr.bf16.mxu1 %v2014_v9 }
 0xaec   : > { %v1102_v27 = vpop.f32.mrb[16].mxu1 }
 0xaed   : > { %v1108_v28 = vadd.f32 %v1102_v27, %v2249_v37  ;;  %v1813_v29 = vpop.f32.mrb[17].mxu1 }
 0xaee   : > { %v1105_v30 = vpop.f32.mrb[18].mxu1 }
 0xaef   : > { %v1814_v31 = vpop.f32.mrb[19].mxu1 }
 0xb6d   : > { %v1212_v32 = vpop.f32.mrb[20].mxu1 }
 0xb6e   : > { %v1218_v33 = vsel %vm447_vm4, %v1212_v32, -1e+30  ;;  %v1827_v34 = vpop.f32.mrb[21].mxu1 }
 0xb6f   : > { %v1215_v35 = vpop.f32.mrb[22].mxu1  ;;  %v1219_v36 = vsel %vm513_vm2, %v1218_v33, -inf }
 0xb70   : > { %1220 = vmax.xlane.f32.xlu0 %v1219_v36  ;;  %v1828_v38 = vpop.f32.mrb[23].mxu1 }
 0xbfd   : > { %v1221_v41 = vpop.xlane.xlu0 %1220 }
 0xbfe   : > { %v1222_v42 = vsub.f32 %v1218_v33, %v1221_v41 }
 0xc00   : > { %v1223_v43 = vmul.f32 1.442695, %v1222_v42 }
 0xc02   : > { %1944 = vpow2.f32 %v1223_v43 }
 0xc0c   : > { %v1945_v44 = vpop.eup %1944 }
 0xc0d   : > { %v1225_v37 = vsel %vm513_vm2, %v1945_v44, 0.0  ;;  %v1228_v45 = vpack.c.bf16 %v1945_v44, %v1945_v44 }
 0xc0e   : > { %1226 = vadd.xlane.f32.xlu1 %v1225_v37 }
 0xc0f   : > { %1832 = vmatmul.mubr.msk.bf16.vlgmr.msra.gmra.mrb[32].mxu0 %vm513_vm2, %v1228_v45 }
 0xc10   : > { %1845 = vmatprep.mubr.msk.bf16.mxu0 %vm2015_vm1, %v2014_v9  ;;  %1842 = vmatpush3.bf16.msra.mxu0 %v1920_v5 }
 0xc11   : > { %1843 = vmatprep.subr.bf16.mxu0 %v2014_v9 }
 0xc9b   : > { %v1227_v46 = vpop.xlane.xlu1 %1226 }
 0xc9c   : > { %1946 = vrcp.f32 %v1227_v46 }
 0xca6   : > { %v1947_v47 = vpop.eup %1946 }
 0xce2   : > { %v1271_v48 = vpop.f32.mrb[32].mxu0 }
 0xce3   : > { %v1278_v49 = vmul.f32 %v1947_v47, %v1271_v48  ;;  %v1833_v50 = vpop.f32.mrb[33].mxu0 }
 0xce4   : > { %v1274_v51 = vpop.f32.mrb[34].mxu0 }
 0xce5   : > { %v1279_v52 = vpack.c.bf16 %v1278_v49, %v1278_v49  ;;  %v1834_v53 = vpop.f32.mrb[35].mxu0 }
 0xce7   : > { %1838 = vmatmul.mubr.msk.bf16.vlgmr.msra.gmra.mrb[24].mxu1 %vm513_vm2, %v1279_v52 }
 0xce8   : > { %1865 = vmatprep.mubr.msk.bf16.mxu1 %vm2015_vm1, %v2014_v9  ;;  %1850 = vmatpush3.bf16.msra.mxu1 %v1922_v6 }
 0xce9   : > { %1851 = vmatprep.subr.bf16.mxu1 %v2014_v9 }
 0xcec   : > { %1852 = vmatpush3.bf16.msra.mxu1 %v1923_v7 }
 0xced   : > { %1853 = vmatprep.subr.bf16.mxu1 %v2014_v9 }
 0xcf0   : > { %1854 = vmatpush3.bf16.msra.mxu1 %v1924_v8 }
 0xcf1   : > { %1855 = vmatprep.subr.bf16.mxu1 %v2014_v9 }
 0xcf4   : > { %1856 = vmatpush3.bf16.msra.mxu1 %v1925_v10 }
 0xcf5   : > { %1857 = vmatprep.subr.bf16.mxu1 %v2014_v9 }
 0xcf8   : > { %1858 = vmatpush3.bf16.msra.mxu1 %v1926_v11 }
 0xcf9   : > { %1859 = vmatprep.subr.bf16.mxu1 %v2014_v9 }
 0xcfc   : > { %1860 = vmatpush3.bf16.msra.mxu1 %v1927_v12 }
 0xcfd   : > { %1861 = vmatprep.subr.bf16.mxu1 %v2014_v9 }
 0xd00   : > { %1862 = vmatpush3.bf16.msra.mxu1 %v1928_v23 }
 0xd01   : > { %1863 = vmatprep.subr.bf16.mxu1 %v2014_v9  ;;  %v1676_v9 = vld [vmem:[%s2435_s11] ss:$0 sm:$0xff] }
 0xd04   : > { %1864 = vmatpush3.bf16.msra.mxu1 %v1929_v24 }
 0xdba   : > { %v1322_v54 = vpop.f32.mrb[24].mxu1 }
 0xdbb   : > { %v1328_v55 = vadd.f32 %v1322_v54, %v1108_v28  ;;  %v1839_v56 = vpop.f32.mrb[25].mxu1 }
 0xdbc   : > { %v1325_v58 = vpop.f32.mrb[26].mxu1 }
 0xdbd   : > { %v1329_v59 = vadd.f32 %v1328_v55, %v2137_v0  ;;  %v1840_v60 = vpop.f32.mrb[27].mxu1  ;;  %v1921_v0 = vld [vmem:[%s2432_s8 + $0x8] sm:$0xff]  }
 0xdbe   : > { %1844 = vmatpush3.bf16.msra.mxu0 %v1921_v0 }
 0xdbf   : > { %v2318_v61 = vadd.f32 %v1669_v57, %v1329_v59 }
 0xdc1   : > { %v1340_v62 = vsel %vm413_vm0, %v2318_v61, 0.0 }
 0xdc2   : > { %1341 = vadd.xlane.f32.xlu0 %v1340_v62 }
 0xe4f   : > { %v1342_v63 = vpop.xlane.xlu0 %1341 }
 0xe50   : > { %v1343_v1 = vmul.f32 0.03125, %v1342_v63 }
 0xe52   : > { %v1344_v2 = vsub.f32 %v2318_v61, %v1343_v1 }
 0xe54   : > { %v1345_v3 = vmul.f32 %v1344_v2, %v1344_v2 }
 0xe56   : > { %v1346_v4 = vsel %vm413_vm0, %v1345_v3, 0.0 }
 0xe57   : > { %1347 = vadd.xlane.f32.xlu0 %v1346_v4 }
 0xee4   : > { %v1348_v13 = vpop.xlane.xlu0 %1347 }
 0xee5   : > { %v1349_v21 = vmul.f32 0.03125, %v1348_v13 }
 0xee7   : > { %v1350_v14 = vadd.f32 1e-05, %v1349_v21 }
 0xee9   : > { %1948 = vrsqrt.f32 %v1350_v14 }
 0xef3   : > { %v1949_v15 = vpop.eup %1948 }
 0xef4   : > { %v1352_v17 = vmul.f32 %v1949_v15, %v1344_v2 }
 0xef6   : > { %v1359_v19 = vmul.f32 %v1670_v16, %v1352_v17 }
 0xef8   : > { %v1366_v20 = vadd.f32 %v1671_v18, %v1359_v19 }
 0xefa   : > { %v1367_v22 = vpack.c.bf16 %v1366_v20, %v1366_v20 }
 0xefc   : > { %1846 = vmatmul.mubr.msk.bf16.vlgmr.msra.gmra.mrb[36].mxu0 %vm413_vm0, %v1367_v22 }
 0xfcf   : > { %v1428_v26 = vpop.f32.mrb[36].mxu0 }
 0xfd0   : > { %v1429_v27 = vadd.f32 %v1672_v25, %v1428_v26  ;;  %v1847_v28 = vpop.f32.mrb[37].mxu0 }
 0xfd1   : > { %v1431_v29 = vpop.f32.mrb[38].mxu0 }
 0xfd2   : > { %v1434_v30 = vmax.f32 %v1429_v27, 0.0  ;;  %v1848_v31 = vpop.f32.mrb[39].mxu0 }
 0xfd4   : > { %v1435_v32 = vpack.c.bf16 %v1434_v30, %v1434_v30 }
 0xfd6   : > { %1866 = vmatmul.mubr.bf16.vlgmr.msra.gmra.mrb[28].mxu1 %v1435_v32 }
0x10a9   : > { %v1541_v33 = vpop.f32.mrb[28].mxu1 }
0x10aa   : > { %v1542_v34 = vadd.f32 %v1676_v9, %v1541_v33  ;;  %v1867_v35 = vpop.f32.mrb[29].mxu1 }
0x10ab   : > { %v1544_v36 = vpop.f32.mrb[30].mxu1 }
0x10ac   : > { %v1547_v38 = vadd.f32 %v1542_v34, %v2318_v61  ;;  %v1868_v41 = vpop.f32.mrb[31].mxu1 }
0x10ae   : > { %1548 = vst.msk [vmem:[%s404_s28] sm:$0xff] %vm413_vm0, %v1547_v38 }
0x10af   : > { %1963 = shalt.err (!%p1960_p3)
}
0x10b0   : > { %s1964_s17 = scalar_lea.hbm %s2381_s0, 128  ;;  %s1968_s15 = scalar_lea.hbm %s2436_s12, 256 }
0x10b1   : > { %p1965_p4 = scmp.ne.s32.totalorder %s2381_s0, %s1964_s17  ;;  %p1969_p9 = scmp.lt.u32.totalorder %s2381_s0, %s2436_s12 }
0x10b2   : > { %p1970_p10 = scmp.lt.u32.totalorder %s1968_s15, %s1964_s17  ;;  %p1972_p12 = scmp.lt.u32.totalorder %s1964_s17, %s2381_s0 }
0x10b3   : > { %p1966_p7 = pnand %p1965_p4, %p2122_p5 }
0x10b4   : > { %p1971_p11 = por %p1970_p10, %p1969_p9 }
0x10b5   : > { %p1967_p8 = pneg %p1966_p7 }
0x10b6   : > { %p1973_p13 = por %p1972_p12, %p1971_p11 }
0x10b8   : > { %p1974_p0 = pnand %p1973_p13, %p1967_p8 }
0x10ba   : > { %1977 = shalt.err (!%p1974_p0)
}
0x10bb   : > { %1869 = dma.vmem_to_hbm [thread:$0]  (%p2122_p5), %s2383_s29, 128, %s2381_s0, %s1550_s25  }
0x10bc PF: > { %p1875_p1 = scmp.ge.s32.totalorder %s2012_s24, 2  ;;  %s1575_s1 = sand.u32 1, %s2000_s21  }
0x10bd   : > { %s1576_s18 = scalar_lea.sflag [#allocation3], %s1575_s1 }
0x10be   : > { %p1872_p2 = pnand %p1875_p1, %p2126_p6 }
0x10c0   : > { %1995 = dma.done.wait (!%p1872_p2), %s1576_s18, 128  }
0x10c1   : > { %1997 = vsyncadd (!%p1872_p2), %s1576_s18, 4294967168  ;;  %p22_p3 = scmp.ge.s32.totalorder %s2109_s27, 4   ;;  %s2443_s21 = smov %s2004_s22 }
0x10c2   : > { %s2444_s22 = smov %s2008_s23  ;;  %s2445_s23 = smov %s2120_s30 }
0x10c3   : > { %s2446_s24 = smov %s2109_s27  ;;  %24 = sbr.rel (!%p22_p3) target bundleno = 6 (0x6), region = 109 }
0x10ca   :  { %1581 = vsyncpa [#allocation3], 1 }
0x10cb   :  { %1583 = vsyncpa [#allocation3 + $0x1], 1 }

</bundles_post_ra>
